<compile_context>
chip_gen: v7x
topology: tpu7x:2x2x1
jax: 0.10.0
libtpu: 0.0.40
codegen_flags: <defaults>
</compile_context>

<pallas_src>
import jax
import jax.numpy as jnp
import numpy as np
from jax.experimental import pallas as pl
from jax.experimental.pallas import tpu as pltpu

# Frozen, unused parameter (torch.nn.Parameter(torch.tensor(0.0))) -- parity only.
DUMMY_PARAM = jnp.zeros((), dtype=jnp.float32)


# ----------------------------------------------------------------------------
# Hot path: Identity.forward(args) -> args.  Zero-traffic metadata op.
# ----------------------------------------------------------------------------
def identity_forward(x):
    """Identity.forward(args) -> args.  No kernel launch, no HBM traffic."""
    return x


# ----------------------------------------------------------------------------
# Optional materialized copy (only if a *distinct* output buffer is required).
# Implemented as one direct HBM->HBM DMA: no VMEM staging, no grid overhead,
# no (8,128) tiling constraint, no VMEM capacity cliff for any element count.
# ----------------------------------------------------------------------------
def _dma_copy_kernel(x_hbm, o_hbm, sem):
    cp = pltpu.make_async_copy(x_hbm, o_hbm, sem)
    cp.start()
    cp.wait()


def identity_copy(x):
    """Return a freshly materialized copy of x via a single HBM->HBM DMA."""
    if x.size == 0:
        return x
    # 0-d arrays get a (1, 1) view so the DMA has a rectangular region;
    # this reshape is metadata-only.
    view = x.reshape(1, 1) if x.ndim == 0 else x
    nbytes = view.size * jnp.dtype(view.dtype).itemsize
    out = pl.pallas_call(
        _dma_copy_kernel,
        out_shape=jax.ShapeDtypeStruct(view.shape, view.dtype),
        in_specs=[pl.BlockSpec(memory_space=pl.ANY)],
        out_specs=pl.BlockSpec(memory_space=pl.ANY),
        scratch_shapes=[pltpu.SemaphoreType.DMA],
        cost_estimate=pl.CostEstimate(
            flops=0, transcendentals=0, bytes_accessed=2 * nbytes),
        compiler_params=pltpu.CompilerParams(has_side_effects=True),
    )(view)
    return out.reshape(x.shape)


if __name__ == "__main__":
    key = jax.random.PRNGKey(0)

    # Main input, NCHW, small shape consistent with the module's typical use.
    x = jax.random.normal(key, (2, 4, 16, 16), dtype=jnp.float32)
    x_host = np.asarray(x)

    # 1) Hot path: forward is a pure pass-through (no kernel, no copy).
    y = identity_forward(x)
    assert y.shape == x_host.shape and y.dtype == x_host.dtype
    assert np.array_equal(np.asarray(y), x_host)

    # 2) Materialized-copy path: exercises the Pallas HBM->HBM DMA kernel.
    copy_fn = jax.jit(identity_copy)
    z = jax.block_until_ready(copy_fn(x))
    assert z.shape == x_host.shape and z.dtype == x_host.dtype
    assert np.array_equal(np.asarray(z), x_host)

    # 3) Same kernel on an element count NOT divisible by 128 (old fallback
    #    path's weak spot) — the DMA copy needs no special casing.
    key2 = jax.random.PRNGKey(1)
    w = jax.random.normal(key2, (3, 5, 7), dtype=jnp.float32)
    w_host = np.asarray(w)
    w_copy = jax.block_until_ready(jax.jit(identity_copy)(w))
    assert w_copy.shape == w_host.shape and w_copy.dtype == w_host.dtype
    assert np.array_equal(np.asarray(w_copy), w_host)

    print("KERNEL_OK")
</pallas_src>

<mosaic_0001>
module attributes {stable_mosaic.version = 11 : i64} {
  func.func @_dma_copy_kernel(%arg0: memref<2x4x16x16xf32, #tpu.memory_space<any>>, %arg1: memref<2x4x16x16xf32, #tpu.memory_space<any>>, %arg2: memref<!tpu.dma_semaphore, #tpu.memory_space<semaphore_mem>>) attributes {dimension_semantics = [], scalar_prefetch = 0 : i64, scratch_operands = 1 : i64, tpu.core_type = #tpu.core_type<tc>} {
    tpu.enqueue_dma source(%arg0 : memref<2x4x16x16xf32, #tpu.memory_space<any>>) target(%arg1 : memref<2x4x16x16xf32, #tpu.memory_space<any>>) target_semaphore(%arg2 : memref<!tpu.dma_semaphore, #tpu.memory_space<semaphore_mem>>)
    tpu.wait_dma2 semaphore(%arg2 : memref<!tpu.dma_semaphore, #tpu.memory_space<semaphore_mem>>) src(%arg0 : memref<2x4x16x16xf32, #tpu.memory_space<any>>) dst(%arg1 : memref<2x4x16x16xf32, #tpu.memory_space<any>>)
    return
  }
}

</mosaic_0001>

<bundles_post_ra>
// kernel: identity_copy.1
= control target key start
LH: loop header
LB: loop body
LE: loop exit
PB: predicated region body
PF: predicated region fallthrough
CT: control target
= control target key end

     0   :  { %s36_s6 = smov [#allocation2]   ;;  %s37_s7 = smov [#allocation3]   ;;  %s55_s0 = inlined_call_operand.hbm [shape: f32[2,4,16,16], index: 0, kind: input, shape index: {}]   ;;  %s56_s1 = inlined_call_operand.hbm [shape: f32[2,4,16,16], index: 1, kind: output, shape index: {}]  }
   0x1   :  { %s38_s8 = smov 0  }
   0x2   :  { %18 = dma.general %s55_s0, 2048, %s56_s1, %s36_s6, %s37_s7, [#allocation4], %s38_s8, 0  }
   0x3   :  { %34 = dma.done.wait [#allocation2], 2048 }
   0x4   :  { %35 = vsyncadd [#allocation2], 4294965248 }
   0x5   :  { %24 = vsyncmov [#allocation2] }
   0x8   :  { %s25_s13 = vpop.sfrf %24 }
   0x9   :  { %p30_p0 = scmp.ne.s32.totalorder %s25_s13, 0 }
   0xb   :  { %29 = shalt.err (%p30_p0)  }

</bundles_post_ra>
